<compile_context>
chip_gen: v6e
topology: v6e:2x2x1
jax: 0.10.0
libtpu: 0.0.40
codegen_flags: <defaults>
</compile_context>

<pallas_src>
import functools

import jax
import jax.numpy as jnp
from jax.experimental import pallas as pl
from jax.experimental.pallas import tpu as pltpu


_VMEM_LIMIT = 48 * 1024 * 1024  # <= v7x 64 MiB/TC, comfortable on v5e/v6e 128 MiB


def _round_up(x, m):
    return (x + m - 1) // m * m


def _choose_tiles(M, N, tm_req=1024, tn_req=1024):
    """Tile sizes: bf16-friendly (multiples of 16 / 128), shrink for small problems."""
    tm = min(tm_req, _round_up(M, 16))
    tn = min(tn_req, _round_up(N, 128))
    return tm, tn, _round_up(M, tm), _round_up(N, tn)


# ----------------------------------------------------------------------------
# Kernel 1: h = tanh(x @ W1 + b1)          (computed ONCE, tiled over M only)
# ----------------------------------------------------------------------------
def _layer1_kernel(x_ref, w1_ref, b1_ref, h_ref):
    # x_ref : (tm, K) bf16   w1_ref: (K, H) bf16   b1_ref: (1, H) f32
    acc = jnp.dot(x_ref[...], w1_ref[...], preferred_element_type=jnp.float32)
    h_ref[...] = jnp.tanh(acc + b1_ref[...]).astype(h_ref.dtype)


# ----------------------------------------------------------------------------
# Kernel 2: y = h @ W2_tile + b2_tile      (grid = (N tiles, M tiles), parallel)
# ----------------------------------------------------------------------------
def _layer2_kernel(h_ref, w2_ref, b2_ref, o_ref):
    # h_ref : (tm, H) bf16   w2_ref: (H, tn) bf16   b2_ref: (1, tn) f32
    y = jnp.dot(h_ref[...], w2_ref[...], preferred_element_type=jnp.float32)
    o_ref[...] = (y + b2_ref[...]).astype(o_ref.dtype)


def _prefix_mlp_prepared(x, w1_c, b1_2d, w2_c, b2_2d, *, n_out, tn, tm_req,
                         out_dtype):
    """x: (M, K) bf16, weights already cast/padded.  Returns (M, n_out) out_dtype."""
    M, K = x.shape
    H = w1_c.shape[1]
    N_pad = w2_c.shape[1]                       # already a multiple of tn
    tm = min(tm_req, _round_up(M, 16))
    M_pad = _round_up(M, tm)
    gm = M_pad // tm
    gn = N_pad // tn

    if M_pad != M:
        x = jnp.pad(x, ((0, M_pad - M), (0, 0)))

    cd_bytes = jnp.dtype(x.dtype).itemsize       # bf16 = 2
    out_bytes = jnp.dtype(out_dtype).itemsize

    # -------- layer 1: h = tanh(x @ W1 + b1), shape (M_pad, H) in bf16 -------
    # NOTE: W1/b1 are resident (constant block index -> fetched once).
    # TODO(synk): for very large hidden (K >= 8192) tile K as an "arbitrary"
    # reduction axis (f32 scratch accumulator) to keep the W1 block out of the
    # double-buffer budget; irrelevant for typical hidden sizes.
    h = pl.pallas_call(
        _layer1_kernel,
        out_shape=jax.ShapeDtypeStruct((M_pad, H), x.dtype),
        grid_spec=pltpu.PrefetchScalarGridSpec(
            num_scalar_prefetch=0,
            grid=(gm,),
            in_specs=[
                pl.BlockSpec((tm, K), lambda i: (i, 0)),   # x tile
                pl.BlockSpec((K, H), lambda i: (0, 0)),    # W1 (resident)
                pl.BlockSpec((1, H), lambda i: (0, 0)),    # b1 (resident)
            ],
            out_specs=pl.BlockSpec((tm, H), lambda i: (i, 0)),
        ),
        compiler_params=pltpu.CompilerParams(
            dimension_semantics=("parallel",),
            vmem_limit_bytes=_VMEM_LIMIT,
        ),
        cost_estimate=pl.CostEstimate(
            flops=2 * M_pad * K * H,
            transcendentals=M_pad * H,
            bytes_accessed=(M_pad * K + K * H + M_pad * H) * cd_bytes + 4 * H,
        ),
    )(x, w1_c, b1_2d)

    # -------- layer 2: y = h @ W2 + b2 ---------------------------------------
    # N is the OUTER grid axis: the W2 block index only depends on j, so each
    # W2 tile is DMA'd exactly once; the tiny h tile is re-fetched per j.
    # Both axes are independent -> "parallel"/"parallel" (megacore / v7x 2-TC).
    out = pl.pallas_call(
        _layer2_kernel,
        out_shape=jax.ShapeDtypeStruct((M_pad, N_pad), out_dtype),
        grid_spec=pltpu.PrefetchScalarGridSpec(
            num_scalar_prefetch=0,
            grid=(gn, gm),
            in_specs=[
                pl.BlockSpec((tm, H), lambda j, i: (i, 0)),   # h tile
                pl.BlockSpec((H, tn), lambda j, i: (0, j)),   # W2 tile (streamed once)
                pl.BlockSpec((1, tn), lambda j, i: (0, j)),   # b2 tile
            ],
            out_specs=pl.BlockSpec((tm, tn), lambda j, i: (i, j)),
        ),
        compiler_params=pltpu.CompilerParams(
            dimension_semantics=("parallel", "parallel"),
            vmem_limit_bytes=_VMEM_LIMIT,
        ),
        cost_estimate=pl.CostEstimate(
            flops=2 * M_pad * H * N_pad,
            transcendentals=0,
            bytes_accessed=(H * N_pad + gn * M_pad * H) * cd_bytes
            + 4 * N_pad + out_bytes * M_pad * N_pad,
        ),
    )(h, w2_c, b2_2d)

    if M_pad != M or N_pad != n_out:
        out = out[:M, :n_out]
    return out


# ----------------------------------------------------------------------------
# One-time parameter preparation (cast + pad OUTSIDE the per-call hot path)
# ----------------------------------------------------------------------------
def prepare_prefix_params(params, *, tm_req=1024, tn_req=1024,
                          compute_dtype=jnp.bfloat16):
    """Cast weights to compute_dtype and pad W2/b2 to the N tile once.

    Returns (prepared_params, meta) where meta holds the static tiling info
    to pass to prefix_encoder_forward.
    """
    emb = params["embedding"]
    w1, b1 = params["w1"], params["b1"]
    w2, b2 = params["w2"], params["b2"]
    H = w1.shape[1]
    N = w2.shape[1]
    _, tn, _, N_pad = _choose_tiles(16, N, tm_req, tn_req)   # M irrelevant here

    w2_c = w2.astype(compute_dtype)
    b2_2d = b2.reshape(1, N).astype(jnp.float32)
    if N_pad != N:
        w2_c = jnp.pad(w2_c, ((0, 0), (0, N_pad - N)))
        b2_2d = jnp.pad(b2_2d, ((0, 0), (0, N_pad - N)))

    prepared = {
        "embedding": emb.astype(compute_dtype),
        "w1": w1.astype(compute_dtype),
        "b1": b1.reshape(1, H).astype(jnp.float32),
        "w2": w2_c,
        "b2": b2_2d,
    }
    if "embedding_np" in params:                 # non-projection branch table
        prepared["embedding_np"] = params["embedding_np"]
    meta = {"n_out": N, "tn": tn, "tm_req": tm_req}
    return prepared, meta


# ----------------------------------------------------------------------------
# PrefixEncoder forward
# ----------------------------------------------------------------------------
@functools.partial(
    jax.jit,
    static_argnames=("n_out", "tn", "tm_req", "out_dtype", "prefix_projection"))
def prefix_encoder_forward(prefix, prepared, *, n_out, tn, tm_req=1024,
                           out_dtype=jnp.float32, prefix_projection=True):
    """prefix: int32 (batch, pre_seq_len) -> (batch, pre_seq_len, n_out)."""
    if prefix_projection:
        B, P = prefix.shape
        # Embedding gather stays a plain jnp.take fused by XLA into the
        # layer-1 input; the table (pre_seq_len x hidden) is negligible vs W2.
        prefix_tokens = jnp.take(prepared["embedding"], prefix.reshape(-1),
                                 axis=0)                       # (B*P, hidden) bf16
        out = _prefix_mlp_prepared(prefix_tokens, prepared["w1"], prepared["b1"],
                                   prepared["w2"], prepared["b2"],
                                   n_out=n_out, tn=tn, tm_req=tm_req,
                                   out_dtype=out_dtype)
        return out.reshape(B, P, n_out)
    else:
        # Non-projection branch is a pure embedding gather (no matmul hot path).
        return jnp.take(prepared["embedding_np"], prefix, axis=0)


# ----------------------------------------------------------------------------
# Deterministic parameter init + references + test harness
# ----------------------------------------------------------------------------
def make_params(key, pre_seq_len, hidden_size, prefix_hidden_size, num_layers):
    k0, k1, k2, k3, k4 = jax.random.split(key, 5)
    out_dim = num_layers * 2 * hidden_size
    scale1 = 1.0 / jnp.sqrt(hidden_size)
    scale2 = 1.0 / jnp.sqrt(prefix_hidden_size)
    return {
        "embedding": jax.random.normal(k0, (pre_seq_len, hidden_size), jnp.float32),
        "w1": jax.random.uniform(k1, (hidden_size, prefix_hidden_size), jnp.float32,
                                 -scale1, scale1),
        "b1": jax.random.uniform(k2, (prefix_hidden_size,), jnp.float32,
                                 -scale1, scale1),
        "w2": jax.random.uniform(k3, (prefix_hidden_size, out_dim), jnp.float32,
                                 -scale2, scale2),
        "b2": jax.random.uniform(k4, (out_dim,), jnp.float32, -scale2, scale2),
    }


def _reference_f32(prefix, params):
    emb = jnp.take(params["embedding"], prefix, axis=0)            # (B, P, hidden)
    h = jnp.tanh(emb @ params["w1"] + params["b1"])
    return h @ params["w2"] + params["b2"]


def _reference_matched(prefix, params, compute_dtype=jnp.bfloat16):
    # Same bf16-input / f32-accumulate precision strategy as the kernel.
    emb = jnp.take(params["embedding"].astype(compute_dtype), prefix, axis=0)
    h = jnp.tanh(
        jnp.dot(emb, params["w1"].astype(compute_dtype),
                preferred_element_type=jnp.float32) + params["b1"])
    h = h.astype(compute_dtype)
    return jnp.dot(h, params["w2"].astype(compute_dtype),
                   preferred_element_type=jnp.float32) + params["b2"]


if __name__ == "__main__":
    # Small config consistent with the module:
    batch = 2
    pre_seq_len = 8
    hidden_size = 32
    prefix_hidden_size = 768          # hard-coded in the PyTorch __init__
    num_hidden_layers = 2             # out_dim = 2 * 2 * 32 = 128

    key = jax.random.PRNGKey(0)
    kp, kx = jax.random.split(key)
    params = make_params(kp, pre_seq_len, hidden_size, prefix_hidden_size,
                         num_hidden_layers)
    prefix = jax.random.randint(kx, (batch, pre_seq_len), 0, pre_seq_len,
                                dtype=jnp.int32)

    # One-time weight preparation (cast/pad happens here, NOT per forward call).
    prepared, meta = prepare_prefix_params(params)

    out = prefix_encoder_forward(prefix, prepared, prefix_projection=True, **meta)
    out = jax.block_until_ready(out)

    expected_shape = (batch, pre_seq_len, num_hidden_layers * 2 * hidden_size)
    assert out.shape == expected_shape, (out.shape, expected_shape)

    # Tight check against a precision-matched (bf16 in / f32 acc) reference.
    ref_m = jax.block_until_ready(_reference_matched(prefix, params))
    assert jnp.allclose(out, ref_m.reshape(out.shape), atol=2e-3, rtol=2e-3), \
        "mismatch vs precision-matched reference"

    # Loose sanity check against the full-f32 reference.
    ref_f32 = jax.block_until_ready(_reference_f32(prefix, params))
    assert jnp.allclose(out, ref_f32, atol=1e-1, rtol=1e-1), \
        "mismatch vs f32 reference"

    print("KERNEL_OK")
</pallas_src>

<mosaic_0001>
module attributes {stable_mosaic.version = 11 : i64} {
  func.func @_layer1_kernel(%arg0: i32, %arg1: memref<16x32xbf16, #tpu.memory_space<vmem>>, %arg2: memref<32x768xbf16, #tpu.memory_space<vmem>>, %arg3: memref<1x768xf32, #tpu.memory_space<vmem>>, %arg4: memref<16x768xbf16, #tpu.memory_space<vmem>>) attributes {dimension_semantics = [#tpu.dimension_semantics<parallel>], iteration_bounds = array<i64: 1>, scalar_prefetch = 0 : i64, scratch_operands = 0 : i64, tpu.core_type = #tpu.core_type<tc>, window_params = [{transform_indices = @transform_0, window_bounds = array<i64: 16, 32>}, {pipeline_mode = #tpu.pipeline_mode<synchronous>, transform_indices = @transform_1, window_bounds = array<i64: 32, 768>}, {pipeline_mode = #tpu.pipeline_mode<synchronous>, transform_indices = @transform_2, window_bounds = array<i64: 1, 768>}, {transform_indices = @transform_3, window_bounds = array<i64: 16, 768>}]} {
    %c0 = arith.constant 0 : index
    %c0_0 = arith.constant 0 : index
    %0 = vector.load %arg1[%c0, %c0_0] : memref<16x32xbf16, #tpu.memory_space<vmem>>, vector<16x32xbf16>
    %c0_1 = arith.constant 0 : index
    %c0_2 = arith.constant 0 : index
    %1 = vector.load %arg2[%c0_1, %c0_2] : memref<32x768xbf16, #tpu.memory_space<vmem>>, vector<32x768xbf16>
    %cst = arith.constant dense<0.000000e+00> : vector<16x768xf32>
    %2 = tpu.matmul %0, %1, %cst {dimension_numbers = #tpu.dot_dimension_numbers<[1], [0], [0], [1], [0, 0, 1, 1], [], []>} : vector<16x32xbf16>, vector<32x768xbf16>, vector<16x768xf32> -> vector<16x768xf32>
    %c0_3 = arith.constant 0 : index
    %c0_4 = arith.constant 0 : index
    %3 = vector.load %arg3[%c0_3, %c0_4] : memref<1x768xf32, #tpu.memory_space<vmem>>, vector<1x768xf32>
    %4 = vector.broadcast %3 : vector<1x768xf32> to vector<16x768xf32>
    %5 = arith.addf %2, %4 : vector<16x768xf32>
    %6 = math.tanh %5 : vector<16x768xf32>
    %7 = arith.truncf %6 : vector<16x768xf32> to vector<16x768xbf16>
    %c0_5 = arith.constant 0 : index
    %c0_6 = arith.constant 0 : index
    %8 = vector.load %arg4[%c0_5, %c0_6] : memref<16x768xbf16, #tpu.memory_space<vmem>>, vector<16x768xbf16>
    tpu.vector_store %arg4[%c0_5, %c0_6], %7 {strides = array<i32>} : memref<16x768xbf16, #tpu.memory_space<vmem>>, vector<16x768xbf16>,
    return
  }
  func.func @transform_0(%arg0: i32) -> (i32, i32) {
    %c0_i32 = arith.constant 0 : i32
    %c0_i32_0 = arith.constant 0 : i32
    return %arg0, %c0_i32 : i32, i32
  }
  func.func @transform_1(%arg0: i32) -> (i32, i32) {
    %c0_i32 = arith.constant 0 : i32
    %c0_i32_0 = arith.constant 0 : i32
    %c0_i32_1 = arith.constant 0 : i32
    return %c0_i32, %c0_i32_0 : i32, i32
  }
  func.func @transform_2(%arg0: i32) -> (i32, i32) {
    %c0_i32 = arith.constant 0 : i32
    %c0_i32_0 = arith.constant 0 : i32
    %c0_i32_1 = arith.constant 0 : i32
    return %c0_i32, %c0_i32_0 : i32, i32
  }
  func.func @transform_3(%arg0: i32) -> (i32, i32) {
    %c0_i32 = arith.constant 0 : i32
    %c0_i32_0 = arith.constant 0 : i32
    return %arg0, %c0_i32 : i32, i32
  }
}

module attributes {stable_mosaic.version = 11 : i64} {
  func.func @_layer2_kernel(%arg0: i32, %arg1: i32, %arg2: memref<16x768xbf16, #tpu.memory_space<vmem>>, %arg3: memref<768x128xbf16, #tpu.memory_space<vmem>>, %arg4: memref<1x128xf32, #tpu.memory_space<vmem>>, %arg5: memref<16x128xf32, #tpu.memory_space<vmem>>) attributes {dimension_semantics = [#tpu.dimension_semantics<parallel>, #tpu.dimension_semantics<parallel>], iteration_bounds = array<i64: 1, 1>, scalar_prefetch = 0 : i64, scratch_operands = 0 : i64, tpu.core_type = #tpu.core_type<tc>, window_params = [{transform_indices = @transform_0, window_bounds = array<i64: 16, 768>}, {transform_indices = @transform_1, window_bounds = array<i64: 768, 128>}, {transform_indices = @transform_2, window_bounds = array<i64: 1, 128>}, {transform_indices = @transform_3, window_bounds = array<i64: 16, 128>}]} {
    %c0 = arith.constant 0 : index
    %c0_0 = arith.constant 0 : index
    %0 = vector.load %arg2[%c0, %c0_0] : memref<16x768xbf16, #tpu.memory_space<vmem>>, vector<16x768xbf16>
    %c0_1 = arith.constant 0 : index
    %c0_2 = arith.constant 0 : index
    %1 = vector.load %arg3[%c0_1, %c0_2] : memref<768x128xbf16, #tpu.memory_space<vmem>>, vector<768x128xbf16>
    %cst = arith.constant dense<0.000000e+00> : vector<16x128xf32>
    %2 = tpu.matmul %0, %1, %cst {dimension_numbers = #tpu.dot_dimension_numbers<[1], [0], [0], [1], [0, 0, 1, 1], [], []>} : vector<16x768xbf16>, vector<768x128xbf16>, vector<16x128xf32> -> vector<16x128xf32>
    %c0_3 = arith.constant 0 : index
    %c0_4 = arith.constant 0 : index
    %3 = vector.load %arg4[%c0_3, %c0_4] : memref<1x128xf32, #tpu.memory_space<vmem>>, vector<1x128xf32>
    %4 = vector.broadcast %3 : vector<1x128xf32> to vector<16x128xf32>
    %5 = arith.addf %2, %4 : vector<16x128xf32>
    %c0_5 = arith.constant 0 : index
    %c0_6 = arith.constant 0 : index
    %6 = vector.load %arg5[%c0_5, %c0_6] : memref<16x128xf32, #tpu.memory_space<vmem>>, vector<16x128xf32>
    tpu.vector_store %arg5[%c0_5, %c0_6], %5 {strides = array<i32>} : memref<16x128xf32, #tpu.memory_space<vmem>>, vector<16x128xf32>,
    return
  }
  func.func @transform_0(%arg0: i32, %arg1: i32) -> (i32, i32) {
    %c0_i32 = arith.constant 0 : i32
    %c0_i32_0 = arith.constant 0 : i32
    return %arg1, %c0_i32 : i32, i32
  }
  func.func @transform_1(%arg0: i32, %arg1: i32) -> (i32, i32) {
    %c0_i32 = arith.constant 0 : i32
    %c0_i32_0 = arith.constant 0 : i32
    return %c0_i32, %arg0 : i32, i32
  }
  func.func @transform_2(%arg0: i32, %arg1: i32) -> (i32, i32) {
    %c0_i32 = arith.constant 0 : i32
    %c0_i32_0 = arith.constant 0 : i32
    return %c0_i32, %arg0 : i32, i32
  }
  func.func @transform_3(%arg0: i32, %arg1: i32) -> (i32, i32) {
    %c0_i32 = arith.constant 0 : i32
    return %arg1, %arg0 : i32, i32
  }
}

</mosaic_0001>

<bundles_post_ra>
// kernel: prefix_encoder_forward.2
= control target key start
LH: loop header
LB: loop body
LE: loop exit
PB: predicated region body
PF: predicated region fallthrough
CT: control target
= control target key end

     0   :  { %v389_v1 = vmov 0   ;;  %vm126_vm0 = vcmask 261120   ;;  %v31_v14 = vlaneseq  ;;  %s470_s1 = inlined_call_operand.vmem [shape: bf16[32,768], index: 1, kind: input, shape index: {}]   ;;  %s471_s0 = inlined_call_operand.vmem [shape: bf16[16,32], index: 0, kind: input, shape index: {}]   ;;  %s472_s2 = inlined_call_operand.vmem [shape: f32[1,768], index: 2, kind: input, shape index: {}]   ;;  %s473_s3 = inlined_call_operand.vmem [shape: bf16[16,768], index: 3, kind: output, shape index: {}]  }
   0x1   :  { %v346_v0 = vld [vmem:[%s470_s1 + $0x34] ss:$24 sps:$4 sm:$0xff]   ;;  %162 = vmatprep.mubr.bf16.mxu0 %v389_v1  ;;  %205 = vmatprep.mubr.bf16.mxu1 %v389_v1  ;;  %v348_v2 = vld [vmem:[%s470_s1 + $0x30] ss:$24 sps:$4 sm:$0xff]   ;;  %v351_v4 = vld [vmem:[%s470_s1 + $0x4] ss:$24 sps:$4 sm:$0xff]  }
   0x2   :  { %142 = vmatprep.subr.bf16.mxu0 %v346_v0  ;;  %v349_v3 = vld [vmem:[%s470_s1 + $0x3c] ss:$24 sps:$4 sm:$0xff]   ;;  %v353_v5 = vld [vmem:[%s470_s1 + $0x38] ss:$24 sps:$4 sm:$0xff]   ;;  %v355_v7 = vld [vmem:[%s470_s1 + $0xc] ss:$24 sps:$4 sm:$0xff]  }
   0x3   :  { %143 = vmatpush1.bf16.msra.mxu0 %v348_v2  ;;  %v354_v6 = vld [vmem:[%s470_s1] ss:$24 sps:$4 sm:$0xff]   ;;  %185 = vmatprep.subr.bf16.mxu1 %v349_v3  ;;  %v361_v11 = vld [vmem:[%s470_s1 + $0x44] ss:$24 sps:$4 sm:$0xff]   ;;  %v364_v12 = vld [vmem:[%s470_s1 + $0x14] ss:$24 sps:$4 sm:$0xff]  }
   0x4   :  { %144 = vmatprep.subr.bf16.mxu0 %v351_v4  ;;  %186 = vmatpush1.bf16.msra.mxu1 %v353_v5  ;;  %v357_v8 = vld [vmem:[%s471_s0] sm:$0xff]   ;;  %v362_v13 = vld [vmem:[%s470_s1 + $0x10] ss:$24 sps:$4 sm:$0xff]   ;;  %v32_v15 = vshrl.u32 %v31_v14, 7 }
   0x5   :  { %187 = vmatprep.subr.bf16.mxu1 %v355_v7  ;;  %v358_v9 = vld [vmem:[%s470_s1 + $0x8] ss:$24 sps:$4 sm:$0xff]  }
   0x6   :  { %v359_v10 = vld [vmem:[%s470_s1 + $0x40] ss:$24 sps:$4 sm:$0xff]   ;;  %v33_v16 = vsub.s32 0, %v32_v15  ;;  %v37_v18 = vsub.s32 1, %v32_v15  ;;  %v41_v19 = vsub.s32 2, %v32_v15  ;;  %v45_v21 = vsub.s32 3, %v32_v15 }
   0x7   :  { %145 = vmatpush1.bf16.msra.mxu0 %v354_v6  ;;  %v29_v17 = vld [vmem:[%s472_s2] sm:$0x3f]  ;;  %v49_v27 = vsub.s32 4, %v32_v15  ;;  %v53_v32 = vsub.s32 5, %v32_v15 }
   0x8   :  { %188 = vmatpush1.bf16.msra.mxu1 %v358_v9  ;;  %228 = vmatprep.subr.bf16.mxu0 %v361_v11  ;;  %v34_v20 = vrot.slane %v29_v17, %v33_v16  ;;  %v38_v22 = vrot.slane %v29_v17, %v37_v18  ;;  %v42_v23 = vrot.slane %v29_v17, %v41_v19 }
   0x9   :  { %v46_v26 = vrot.slane %v29_v17, %v45_v21  ;;  %v50_v37 = vrot.slane %v29_v17, %v49_v27  ;;  %v54_v42 = vrot.slane %v29_v17, %v53_v32 }
   0xa   :  { %330 = vmatmul.mubr.msk.bf16.vlgmr.msra.gmra.mxu0 %vm126_vm0, %v357_v8 }
   0xb   :  { %229 = vmatpush1.bf16.msra.mxu0 %v359_v10  ;;  %248 = vmatprep.mubr.bf16.mxu0 %v389_v1 }
   0xc   :  { %331 = vmatmul.mubr.msk.bf16.vlgmr.msra.gmra.mxu1 %vm126_vm0, %v357_v8  ;;  %230 = vmatprep.subr.bf16.mxu0 %v364_v12 }
   0xf   :  { %231 = vmatpush1.bf16.msra.mxu0 %v362_v13 }
  0x12   :  { %332 = vmatmul.mubr.msk.bf16.vlgmr.msra.gmra.mxu0 %vm126_vm0, %v357_v8 }
  0xca   :  { %v164_v24 = vpop.f32.mrf.mxu0 }
  0xcb   :  { %v165_v25 = vadd.f32 %v164_v24, %v34_v20 }
  0xcc   :  { %v166_v28 = vpop.f32.mrf.mxu0  ;;  %v207_v29 = vpop.f32.mrf.mxu1 }
  0xcd   :  { %v167_v30 = vadd.f32 %v166_v28, %v38_v22  ;;  %v208_v31 = vadd.f32 %v207_v29, %v42_v23  ;;  %365 = vtanh.f32 %v165_v25 }
  0xce   :  { %v168_v33 = vpop.f32.mrf.mxu0  ;;  %v209_v34 = vpop.f32.mrf.mxu1 }
  0xcf   :  { %367 = vtanh.f32 %v167_v30  ;;  %v169_v35 = vadd.f32 %v168_v33, %v34_v20  ;;  %v210_v36 = vadd.f32 %v209_v34, %v46_v26 }
  0xd0   :  { %369 = vtanh.f32 %v208_v31  ;;  %v170_v38 = vpop.f32.mrf.mxu0  ;;  %v211_v39 = vpop.f32.mrf.mxu1 }
  0xd1   :  { %371 = vtanh.f32 %v169_v35  ;;  %v171_v40 = vadd.f32 %v170_v38, %v38_v22  ;;  %v212_v41 = vadd.f32 %v211_v39, %v42_v23 }
  0xd2   :  { %373 = vtanh.f32 %v210_v36  ;;  %v250_v43 = vpop.f32.mrf.mxu0  ;;  %v213_v44 = vpop.f32.mrf.mxu1 }
  0xd3   :  { %375 = vtanh.f32 %v171_v40  ;;  %v251_v45 = vadd.f32 %v250_v43, %v50_v37  ;;  %v214_v46 = vadd.f32 %v213_v44, %v46_v26 }
  0xd4   :  { %377 = vtanh.f32 %v212_v41  ;;  %v252_v47 = vpop.f32.mrf.mxu0 }
  0xd5   :  { %379 = vtanh.f32 %v251_v45  ;;  %v253_v48 = vadd.f32 %v252_v47, %v54_v42 }
  0xd6   :  { %381 = vtanh.f32 %v214_v46  ;;  %v254_v49 = vpop.f32.mrf.mxu0 }
  0xd7   :  { %383 = vtanh.f32 %v253_v48  ;;  %v255_v50 = vadd.f32 %v254_v49, %v50_v37 }
  0xd8   :  { %v256_v51 = vpop.f32.mrf.mxu0 }
  0xd9   :  { %v257_v52 = vadd.f32 %v256_v51, %v54_v42  ;;  %385 = vtanh.f32 %v255_v50 }
  0xda   :  { %v366_v53 = vpop.eup %365 }
  0xdb   :  { %387 = vtanh.f32 %v257_v52 }
  0xdc   :  { %v368_v54 = vpop.eup %367 }
  0xdd   :  { %v370_v55 = vpop.eup %369  ;;  %v339_v56 = vpack.c.bf16 %v368_v54, %v366_v53 }
  0xde   :  { %v372_v57 = vpop.eup %371 }
  0xdf   :  { %v374_v58 = vpop.eup %373  ;;  %307 = vst [vmem:[%s473_s3] sm:$0xff] %v339_v56 }
  0xe0   :  { %v376_v59 = vpop.eup %375  ;;  %v340_v60 = vpack.c.bf16 %v374_v58, %v370_v55 }
  0xe1   :  { %v378_v61 = vpop.eup %377  ;;  %v342_v62 = vpack.c.bf16 %v376_v59, %v372_v57 }
  0xe2   :  { %v380_v63 = vpop.eup %379  ;;  %308 = vst [vmem:[%s473_s3 + $0x8] sm:$0xff] %v340_v60 }
  0xe3   :  { %v382_v0 = vpop.eup %381  ;;  %310 = vst [vmem:[%s473_s3 + $0x18] sm:$0xff] %v342_v62 }
  0xe4   :  { %v384_v1 = vpop.eup %383  ;;  %v343_v2 = vpack.c.bf16 %v382_v0, %v378_v61 }
  0xe5   :  { %v341_v3 = vpack.c.bf16 %v384_v1, %v380_v63 }
  0xe6   :  { %311 = vst [vmem:[%s473_s3 + $0x20] sm:$0xff] %v343_v2  ;;  %v386_v4 = vpop.eup %385 }
  0xe7   :  { %309 = vst [vmem:[%s473_s3 + $0x10] sm:$0xff] %v341_v3 }
  0xe8   :  { %v388_v5 = vpop.eup %387 }
  0xe9   :  { %v344_v6 = vpack.c.bf16 %v388_v5, %v386_v4 }
  0xeb   :  { %312 = vst [vmem:[%s473_s3 + $0x28] sm:$0xff] %v344_v6 }

// kernel: prefix_encoder_forward.3
= control target key start
LH: loop header
LB: loop body
LE: loop exit
PB: predicated region body
PF: predicated region fallthrough
CT: control target
= control target key end

     0   :  { %8 = vsyncpa [#allocation3], 0  ;;  %s880_s0 = inlined_call_operand.vmem [shape: bf16[16,768], index: 0, kind: input, shape index: {}]   ;;  %s881_s1 = inlined_call_operand.hbm [shape: bf16[768,128], index: 1, kind: input, shape index: {}]   ;;  %s882_s2 = inlined_call_operand.vmem [shape: f32[1,128], index: 2, kind: input, shape index: {}]   ;;  %s883_s3 = inlined_call_operand.hbm [shape: f32[16,128], index: 3, kind: output, shape index: {}]  }
   0x1   :  { %9 = vsyncpa [#allocation4], 0  ;;  %s827_s12 = smov [#allocation2]  }
   0x2   :  { %s17_s13 = sshll.u32 %s827_s12, 4  ;;  %s18_s13 = int_to_ptr.vmem [resolvable:$true] %s17_s13 }
   0x3   :  { %s791_s14 = scalar_lea.vmem %s18_s13, 6144  ;;  %p796_p1 = scmp.lt.s32.totalorder %s18_s13, %s18_s13 }
   0x4   :  { %p792_p0 = scmp.ne.s32.totalorder %s18_s13, %s791_s14  ;;  %p797_p2 = scmp.lt.s32.totalorder %s791_s14, %s791_s14 }
   0x6   :  { %p798_p3 = por %p797_p2, %p796_p1 }
   0x8   :  { %p799_p4 = pnand %p798_p3, %p792_p0 }
   0xa   :  { %802 = shalt.err (!%p799_p4)
}
   0xb   :  { %s828_s15 = smov 64   ;;  %s829_s16 = smov 4  }
   0xc   :  { %23 = dma.hbm_to_vmem [thread:$0]  %s881_s1, 6144, %s18_s13, [#allocation3], %s828_s15, %s828_s15, %s829_s16  }
   0xd   :  { %823 = dma.done.wait [#allocation3], 6144  }
   0xe   :  { %824 = vsyncadd [#allocation3], 4294961152  ;;  %v726_v0 = vld [vmem:[#allocation2 + $0x78] sm:$0xff]   ;;  %v730_v4 = vld [vmem:[#allocation2 + $0x70] sm:$0xff]  }
   0xf   :  { %v727_v1 = vld [vmem:[#allocation2 + $0x38] sm:$0xff]   ;;  %654 = vmatprep.subr.bf16.mxu0 %v726_v0  ;;  %v731_v5 = vld [vmem:[#allocation2 + $0x30] sm:$0xff]   ;;  %v734_v8 = vld [vmem:[#allocation2 + $0x68] sm:$0xff]  }
  0x10   :  { %v728_v2 = vld [vmem:[#allocation2 + $0xf8] sm:$0xff]   ;;  %655 = vmatpush3.bf16.msra.mxu0 %v727_v1  ;;  %v732_v6 = vld [vmem:[#allocation2 + $0xf0] sm:$0xff]   ;;  %v735_v9 = vld [vmem:[#allocation2 + $0x28] sm:$0xff]  }
  0x11   :  { %v729_v3 = vld [vmem:[#allocation2 + $0xb8] sm:$0xff]   ;;  %676 = vmatprep.subr.bf16.mxu1 %v728_v2  ;;  %656 = vmatprep.subr.bf16.mxu0 %v730_v4  ;;  %v733_v7 = vld [vmem:[#allocation2 + $0xb0] sm:$0xff]   ;;  %v736_v10 = vld [vmem:[#allocation2 + $0xe8] sm:$0xff]  }
  0x12   :  { %677 = vmatpush3.bf16.msra.mxu1 %v729_v3  ;;  %v737_v11 = vld [vmem:[#allocation2 + $0xa8] sm:$0xff]   ;;  %v738_v12 = vld [vmem:[#allocation2 + $0x60] sm:$0xff]   ;;  %v742_v16 = vld [vmem:[#allocation2 + $0x58] sm:$0xff]  }
  0x13   :  { %678 = vmatprep.subr.bf16.mxu1 %v732_v6  ;;  %v739_v13 = vld [vmem:[#allocation2 + $0x20] sm:$0xff]   ;;  %v743_v17 = vld [vmem:[#allocation2 + $0x18] sm:$0xff]   ;;  %v746_v20 = vld [vmem:[#allocation2 + $0x50] sm:$0xff]  }
  0x14   :  { %657 = vmatpush3.bf16.msra.mxu0 %v731_v5  ;;  %v740_v14 = vld [vmem:[#allocation2 + $0xe0] sm:$0xff]   ;;  %v744_v18 = vld [vmem:[#allocation2 + $0xd8] sm:$0xff]   ;;  %v747_v21 = vld [vmem:[#allocation2 + $0x10] sm:$0xff]  }
  0x15   :  { %658 = vmatprep.subr.bf16.mxu0 %v734_v8  ;;  %v741_v15 = vld [vmem:[#allocation2 + $0xa0] sm:$0xff]   ;;  %v745_v19 = vld [vmem:[#allocation2 + $0x98] sm:$0xff]   ;;  %v748_v22 = vld [vmem:[#allocation2 + $0xd0] sm:$0xff]  }
  0x16   :  { %679 = vmatpush3.bf16.msra.mxu1 %v733_v7  ;;  %v749_v23 = vld [vmem:[#allocation2 + $0x90] sm:$0xff]   ;;  %v750_v24 = vld [vmem:[#allocation2 + $0x48] sm:$0xff]   ;;  %v754_v28 = vld [vmem:[#allocation2 + $0x40] sm:$0xff]  }
  0x17   :  { %680 = vmatprep.subr.bf16.mxu1 %v736_v10  ;;  %v751_v25 = vld [vmem:[#allocation2 + $0x8] sm:$0xff]   ;;  %v755_v29 = vld [vmem:[#allocation2] sm:$0xff]   ;;  %v761_v34 = vld [vmem:[#allocation2 + $0x178] sm:$0xff]  }
  0x18   :  { %659 = vmatpush3.bf16.msra.mxu0 %v735_v9  ;;  %v752_v26 = vld [vmem:[#allocation2 + $0xc8] sm:$0xff]   ;;  %v756_v30 = vld [vmem:[#allocation2 + $0xc0] sm:$0xff]   ;;  %v765_v37 = vld [vmem:[#allocation2 + $0x138] sm:$0xff]  }
  0x19   :  { %660 = vmatprep.subr.bf16.mxu0 %v738_v12  ;;  %v753_v27 = vld [vmem:[#allocation2 + $0x88] sm:$0xff]   ;;  %v757_v31 = vld [vmem:[%s880_s0] ss:$24 sps:$4 sm:$0xff]   ;;  %v759_v32 = vld [vmem:[%s880_s0 + $0x4] ss:$24 sps:$4 sm:$0xff]  }
  0x1a   :  { %681 = vmatpush3.bf16.msra.mxu1 %v737_v11  ;;  %v760_v33 = vld [vmem:[#allocation2 + $0x80] sm:$0xff]   ;;  %489 = vmatprep.mubr.bf16.mxu0 %v759_v32  ;;  %v766_v38 = vld [vmem:[#allocation2 + $0x170] sm:$0xff]   ;;  %v768_v40 = vld [vmem:[#allocation2 + $0x168] sm:$0xff]  }
  0x1b   :  { %682 = vmatprep.subr.bf16.mxu1 %v740_v14  ;;  %v762_v35 = vld [vmem:[%s880_s0 + $0x8] ss:$24 sps:$4 sm:$0xff]   ;;  %v764_v36 = vld [vmem:[%s880_s0 + $0xc] ss:$24 sps:$4 sm:$0xff]   ;;  %v767_v39 = vld [vmem:[#allocation2 + $0x130] sm:$0xff]  }
  0x1c   :  { %661 = vmatpush3.bf16.msra.mxu0 %v739_v13  ;;  %530 = vmatprep.mubr.bf16.mxu1 %v764_v36  ;;  %v769_v41 = vld [vmem:[#allocation2 + $0x128] sm:$0xff]   ;;  %v770_v42 = vld [vmem:[#allocation2 + $0x160] sm:$0xff]   ;;  %v772_v44 = vld [vmem:[#allocation2 + $0x158] sm:$0xff]  }
  0x1d   :  { %662 = vmatprep.subr.bf16.mxu0 %v742_v16  ;;  %v771_v43 = vld [vmem:[#allocation2 + $0x120] sm:$0xff]   ;;  %v773_v45 = vld [vmem:[#allocation2 + $0x118] sm:$0xff]   ;;  %v774_v46 = vld [vmem:[#allocation2 + $0x150] sm:$0xff]  }
  0x1e   :  { %683 = vmatpush3.bf16.msra.mxu1 %v741_v15  ;;  %v782_v47 = vld [vmem:[%s880_s0 + $0x14] ss:$24 sps:$4 sm:$0xff]   ;;  %v778_v51 = vld [vmem:[#allocation2 + $0x140] sm:$0xff]   ;;  %v780_v53 = vld [vmem:[%s880_s0 + $0x10] ss:$24 sps:$4 sm:$0xff]   ;;  %s830_s0 = smov [#allocation5]  }
  0x1f   :  { %684 = vmatprep.subr.bf16.mxu1 %v744_v18  ;;  %v775_v48 = vld [vmem:[#allocation2 + $0x110] sm:$0xff]   ;;  %v776_v49 = vld [vmem:[#allocation2 + $0x148] sm:$0xff]   ;;  %v779_v52 = vld [vmem:[#allocation2 + $0x100] sm:$0xff]   ;;  %s587_s5 = sshll.u32 %s830_s0, 4  ;;  %s588_s5 = int_to_ptr.vmem [resolvable:$true] %s587_s5 }
  0x20   :  { %663 = vmatpush3.bf16.msra.mxu0 %v743_v17  ;;  %v777_v50 = vld [vmem:[#allocation2 + $0x108] sm:$0xff]   ;;  %v599_v60 = vld [vmem:[%s882_s2] ss:$0 sm:$0xff]  ;;  %s803_s2 = scalar_lea.vmem %s588_s5, 256  ;;  %p808_p6 = scmp.lt.s32.totalorder %s588_s5, %s588_s5 }
  0x21   :  { %664 = vmatprep.subr.bf16.mxu0 %v746_v20  ;;  %p804_p5 = scmp.ne.s32.totalorder %s588_s5, %s803_s2  ;;  %p809_p7 = scmp.lt.s32.totalorder %s803_s2, %s803_s2 }
  0x22   :  { %685 = vmatpush3.bf16.msra.mxu1 %v745_v19 }
  0x23   :  { %686 = vmatprep.subr.bf16.mxu1 %v748_v22  ;;  %p810_p8 = por %p809_p7, %p808_p6 }
  0x24   :  { %665 = vmatpush3.bf16.msra.mxu0 %v747_v21 }
  0x25   :  { %666 = vmatprep.subr.bf16.mxu0 %v750_v24  ;;  %p811_p9 = pnand %p810_p8, %p804_p5 }
  0x26   :  { %687 = vmatpush3.bf16.msra.mxu1 %v749_v23 }
  0x27   :  { %688 = vmatprep.subr.bf16.mxu1 %v752_v26 }
  0x28   :  { %667 = vmatpush3.bf16.msra.mxu0 %v751_v25 }
  0x29   :  { %668 = vmatprep.subr.bf16.mxu0 %v754_v28 }
  0x2a   :  { %689 = vmatpush3.bf16.msra.mxu1 %v753_v27 }
  0x2b   :  { %690 = vmatprep.subr.bf16.mxu1 %v756_v30 }
  0x2c   :  { %669 = vmatpush3.bf16.msra.mxu0 %v755_v29 }
  0x2d   :  { %698 = vmatprep.subr.bf16.mxu0 %v761_v34 }
  0x2e   :  { %691 = vmatpush3.bf16.msra.mxu1 %v760_v33 }
  0x2f   :  { %490 = vmatmul.mubr.bf16.vlgmr.msra.gmra.mxu0 %v757_v31 }
  0x30   :  { %699 = vmatpush3.bf16.msra.mxu0 %v765_v37  ;;  %571 = vmatprep.mubr.bf16.mxu0 %v782_v47 }
  0x31   :  { %531 = vmatmul.mubr.bf16.vlgmr.msra.gmra.mxu1 %v762_v35  ;;  %700 = vmatprep.subr.bf16.mxu0 %v766_v38 }
  0x34   :  { %701 = vmatpush3.bf16.msra.mxu0 %v767_v39 }
  0x35   :  { %702 = vmatprep.subr.bf16.mxu0 %v768_v40 }
  0x38   :  { %703 = vmatpush3.bf16.msra.mxu0 %v769_v41 }
  0x39   :  { %704 = vmatprep.subr.bf16.mxu0 %v770_v42 }
  0x3c   :  { %705 = vmatpush3.bf16.msra.mxu0 %v771_v43 }
  0x3d   :  { %706 = vmatprep.subr.bf16.mxu0 %v772_v44 }
  0x40   :  { %707 = vmatpush3.bf16.msra.mxu0 %v773_v45 }
  0x41   :  { %708 = vmatprep.subr.bf16.mxu0 %v774_v46 }
  0x44   :  { %709 = vmatpush3.bf16.msra.mxu0 %v775_v48 }
  0x45   :  { %710 = vmatprep.subr.bf16.mxu0 %v776_v49 }
  0x48   :  { %711 = vmatpush3.bf16.msra.mxu0 %v777_v50 }
  0x49   :  { %712 = vmatprep.subr.bf16.mxu0 %v778_v51 }
  0x4c   :  { %713 = vmatpush3.bf16.msra.mxu0 %v779_v52 }
  0x4f   :  { %572 = vmatmul.mubr.bf16.vlgmr.msra.gmra.mxu0 %v780_v53 }
  0xef   :  { %v670_v54 = vpop.f32.mrf.mxu0 }
  0xf1   :  { %v671_v55 = vpop.f32.mrf.mxu0  ;;  %v692_v56 = vpop.f32.mrf.mxu1 }
  0xf2   :  { %v672_v59 = vadd.f32 %v671_v55, %v670_v54 }
  0xf3   :  { %v673_v57 = vpop.f32.mrf.mxu0  ;;  %v693_v58 = vpop.f32.mrf.mxu1 }
  0xf4   :  { %v492_v63 = vadd.f32 %v672_v59, %v599_v60  ;;  %v694_v0 = vadd.f32 %v693_v58, %v692_v56 }
  0xf5   :  { %v674_v61 = vpop.f32.mrf.mxu0  ;;  %v695_v62 = vpop.f32.mrf.mxu1 }
  0xf6   :  { %v675_v1 = vadd.f32 %v674_v61, %v673_v57  ;;  %v533_v5 = vadd.f32 %v694_v0, %v492_v63 }
  0xf7   :  { %v696_v2 = vpop.f32.mrf.mxu1 }
  0xf8   :  { %v495_v6 = vadd.f32 %v675_v1, %v599_v60  ;;  %v697_v7 = vadd.f32 %v696_v2, %v695_v62 }
  0xfa   :  { %v536_v12 = vadd.f32 %v697_v7, %v495_v6 }
 0x10f   :  { %v714_v3 = vpop.f32.mrf.mxu0 }
 0x111   :  { %v715_v4 = vpop.f32.mrf.mxu0 }
 0x112   :  { %v716_v8 = vadd.f32 %v715_v4, %v714_v3 }
 0x113   :  { %v717_v9 = vpop.f32.mrf.mxu0 }
 0x114   :  { %v574_v10 = vadd.f32 %v716_v8, %v533_v5 }
 0x115   :  { %v718_v11 = vpop.f32.mrf.mxu0 }
 0x116   :  { %580 = vst [vmem:[#allocation5] sm:$0xff] %v574_v10  ;;  %v719_v13 = vadd.f32 %v718_v11, %v717_v9 }
 0x118   :  { %v577_v14 = vadd.f32 %v719_v13, %v536_v12 }
 0x11a   :  { %581 = vst [vmem:[#allocation5 + $0x8] sm:$0xff] %v577_v14 }
 0x11b   :  { %814 = shalt.err (!%p811_p9)
}
 0x11c   :  { %s831_s6 = smov 128   ;;  %s832_s7 = smov 8  }
 0x11d   :  { %593 = dma.vmem_to_hbm [thread:$0]  %s588_s5, 256, %s883_s3, [#allocation4], %s831_s6, %s831_s6, %s832_s7  }
 0x11e   :  { %825 = dma.done.wait [#allocation4], 256  }
 0x11f   :  { %826 = vsyncadd [#allocation4], 4294967040 }
 0x120   :  { %597 = vsyncpa [#allocation3], 1 }
 0x121   :  { %598 = vsyncpa [#allocation4], 1 }

</bundles_post_ra>
